<compile_context>
chip_gen: v7x
topology: tpu7x:2x2x1
jax: 0.10.0
libtpu: 0.0.40
codegen_flags: <defaults>
</compile_context>

<pallas_src>
import functools
import math

import jax
import jax.numpy as jnp
from jax.experimental import pallas as pl
from jax.experimental.pallas import tpu as pltpu


def _round_up(a, b):
    return ((a + b - 1) // b) * b


# --------------------------------------------------------------------------
# Linear kernels: y = x @ W (+ b).  W is stored (in, out)  (== torch W.T).
# --------------------------------------------------------------------------

def _linear_bias_kernel(x_ref, w_ref, b_ref, o_ref):
    acc = jnp.dot(x_ref[...], w_ref[...], preferred_element_type=jnp.float32)
    acc = acc + b_ref[...].astype(jnp.float32)   # bias added once to f32 accumulator
    o_ref[...] = acc.astype(o_ref.dtype)


def _linear_nobias_kernel(x_ref, w_ref, o_ref):
    acc = jnp.dot(x_ref[...], w_ref[...], preferred_element_type=jnp.float32)
    o_ref[...] = acc.astype(o_ref.dtype)


@functools.partial(jax.jit, static_argnames=("tm",))
def linear_pallas(x2d, w, b=None, *, tm=256):
    """x2d: (M, in_f), w: (in_f, out_f), b: (out_f,) or None -> (M, out_f)."""
    M, in_f = x2d.shape
    out_f = w.shape[1]
    itemsize = x2d.dtype.itemsize

    # Row tile: large by default, clamped to the (8-aligned) problem size.
    tm_eff = min(tm, _round_up(M, 8))
    M_pad = _round_up(M, tm_eff)
    if M_pad != M:
        x2d = jnp.pad(x2d, ((0, M_pad - M), (0, 0)))

    grid = (M_pad // tm_eff,)

    # Explicit VMEM budget: weights single-buffered, x/out double-buffered.
    w_bytes = in_f * out_f * w.dtype.itemsize + out_f * 4
    io_bytes = 2 * tm_eff * (in_f + out_f) * itemsize
    vmem_limit = min(int(1.5 * (w_bytes + io_bytes)) + (8 << 20), 64 << 20)

    in_specs = [
        pl.BlockSpec((tm_eff, in_f), lambda i: (i, 0)),
        pl.BlockSpec((in_f, out_f), lambda i: (0, 0),
                     pipeline_mode=pl.Buffered(1)),          # resident weights
    ]
    operands = [x2d, w]
    kernel = _linear_nobias_kernel
    if b is not None:
        in_specs.append(pl.BlockSpec((1, out_f), lambda i: (0, 0),
                                     pipeline_mode=pl.Buffered(1)))
        operands.append(b.reshape(1, out_f))
        kernel = _linear_bias_kernel

    y = pl.pallas_call(
        kernel,
        out_shape=jax.ShapeDtypeStruct((M_pad, out_f), x2d.dtype),
        grid_spec=pltpu.PrefetchScalarGridSpec(
            num_scalar_prefetch=0,
            grid=grid,
            in_specs=in_specs,
            out_specs=pl.BlockSpec((tm_eff, out_f), lambda i: (i, 0)),
        ),
        compiler_params=pltpu.CompilerParams(
            dimension_semantics=("parallel",),
            vmem_limit_bytes=vmem_limit,
        ),
    )(*operands)

    if M_pad != M:
        y = y[:M]
    return y


# --------------------------------------------------------------------------
# Attention core: per (batch*head) program, full-sequence softmax attention.
# --------------------------------------------------------------------------

def _attn_kernel(q_ref, k_ref, v_ref, o_ref, *, scale):
    q = q_ref[0] * jnp.asarray(scale, q_ref.dtype)   # (N, hd), matches torch order
    k = k_ref[0]
    v = v_ref[0]
    # scores (N, N): contract head_dim (axis 1 of both) -> q @ k^T on the MXU.
    s = jax.lax.dot_general(q, k, (((1,), (1,)), ((), ())),
                            preferred_element_type=jnp.float32)
    # numerically-stable softmax in f32
    s_max = jnp.max(s, axis=-1, keepdims=True)
    p = jnp.exp(s - s_max)
    p = p / jnp.sum(p, axis=-1, keepdims=True)
    # attn_drop(p=0.0) is identity.
    o = jnp.dot(p.astype(v.dtype), v, preferred_element_type=jnp.float32)
    o_ref[0] = o.astype(o_ref.dtype)


@functools.partial(jax.jit, static_argnames=("scale",))
def attention_core_pallas(q, k, v, *, scale):
    """q, k, v: (B*H, N, hd) -> (B*H, N, hd)."""
    BH, N, hd = q.shape
    kernel = functools.partial(_attn_kernel, scale=scale)
    spec = pl.BlockSpec((1, N, hd), lambda i: (i, 0, 0))

    blk = N * hd * q.dtype.itemsize
    vmem_limit = min(2 * 4 * blk + 2 * N * N * 4 + (8 << 20), 64 << 20)

    return pl.pallas_call(
        kernel,
        out_shape=jax.ShapeDtypeStruct((BH, N, hd), q.dtype),
        grid_spec=pltpu.PrefetchScalarGridSpec(
            num_scalar_prefetch=0,
            grid=(BH,),
            in_specs=[spec, spec, spec],
            out_specs=spec,
        ),
        compiler_params=pltpu.CompilerParams(
            dimension_semantics=("parallel",),
            vmem_limit_bytes=vmem_limit,
        ),
    )(q, k, v)


# --------------------------------------------------------------------------
# Full Attention forward (mirrors the PyTorch module).
# --------------------------------------------------------------------------

def attention_forward(x, params, num_heads):
    """x: (B, N, C) -> (B, N, C)."""
    B, N, C = x.shape
    w_qkv, b_qkv, w_proj, b_proj = params
    hd = C // num_heads
    scale = hd ** (-0.5)

    x2d = x.reshape(B * N, C)
    qkv = linear_pallas(x2d, w_qkv, b_qkv)                       # (B*N, 3C)
    qkv = qkv.reshape(B, N, 3, num_heads, hd)
    qkv = jnp.transpose(qkv, (2, 0, 3, 1, 4))                    # (3, B, H, N, hd)
    q = qkv[0].reshape(B * num_heads, N, hd)
    k = qkv[1].reshape(B * num_heads, N, hd)
    v = qkv[2].reshape(B * num_heads, N, hd)

    o = attention_core_pallas(q, k, v, scale=scale)              # (B*H, N, hd)
    o = o.reshape(B, num_heads, N, hd)
    o = jnp.transpose(o, (0, 2, 1, 3)).reshape(B * N, C)         # (B*N, C)

    y = linear_pallas(o, w_proj, b_proj)                         # (B*N, C)
    # proj_drop(p=0.0) is identity.
    # TODO(synk): dropout with p > 0 (training mode) is not implemented; the
    # module defaults (attn_drop=proj_drop=0.0) make it an identity here.
    return y.reshape(B, N, C)


def init_attention_params(key, dim, num_heads, qkv_bias=False, dtype=jnp.float32):
    """Mimics nn.Linear init: uniform(-1/sqrt(fan_in), 1/sqrt(fan_in)); weights stored (in, out)."""
    k1, k2, k3, k4 = jax.random.split(key, 4)
    lim = 1.0 / math.sqrt(dim)
    w_qkv = jax.random.uniform(k1, (dim, 3 * dim), dtype, -lim, lim)
    b_qkv = jax.random.uniform(k2, (3 * dim,), dtype, -lim, lim) if qkv_bias else None
    w_proj = jax.random.uniform(k3, (dim, dim), dtype, -lim, lim)
    b_proj = jax.random.uniform(k4, (dim,), dtype, -lim, lim)
    return w_qkv, b_qkv, w_proj, b_proj


if __name__ == "__main__":
    key = jax.random.PRNGKey(0)
    kx, kp = jax.random.split(key)

    batch, seq, dim, num_heads = 2, 16, 128, 8      # C multiple of 128 -> lane-dense
    x = jax.random.normal(kx, (batch, seq, dim), dtype=jnp.float32)
    params = init_attention_params(kp, dim, num_heads, qkv_bias=False)

    y = attention_forward(x, params, num_heads)
    y = jax.block_until_ready(y)

    # Pure-JAX reference mirroring the PyTorch forward.
    w_qkv, b_qkv, w_proj, b_proj = params
    B, N, C = x.shape
    hd = C // num_heads
    scale = hd ** (-0.5)
    qkv_r = (x @ w_qkv).reshape(B, N, 3, num_heads, hd).transpose(2, 0, 3, 1, 4)
    q_r, k_r, v_r = qkv_r[0], qkv_r[1], qkv_r[2]
    attn = (q_r * scale) @ jnp.swapaxes(k_r, -2, -1)
    attn = jax.nn.softmax(attn, axis=-1)
    o_r = (attn @ v_r).transpose(0, 2, 1, 3).reshape(B, N, C)
    y_ref = o_r @ w_proj + b_proj

    assert y.shape == (batch, seq, dim)
    max_err = float(jnp.max(jnp.abs(y - y_ref)))
    # tolerance allows for MXU f32 multi-pass vs XLA dot precision differences
    assert jnp.allclose(y, y_ref, atol=1e-3, rtol=1e-3), f"mismatch vs reference, max_err={max_err}"

    print("KERNEL_OK")
</pallas_src>

<mosaic_0001>
module attributes {stable_mosaic.version = 11 : i64} {
  func.func @_linear_nobias_kernel(%arg0: i32, %arg1: memref<32x128xf32, #tpu.memory_space<vmem>>, %arg2: memref<128x384xf32, #tpu.memory_space<vmem>>, %arg3: memref<32x384xf32, #tpu.memory_space<vmem>>) attributes {dimension_semantics = [#tpu.dimension_semantics<parallel>], iteration_bounds = array<i64: 1>, scalar_prefetch = 0 : i64, scratch_operands = 0 : i64, tpu.core_type = #tpu.core_type<tc>, window_params = [{transform_indices = @transform_0, window_bounds = array<i64: 32, 128>}, {pipeline_mode = #tpu.pipeline_mode<synchronous>, transform_indices = @transform_1, window_bounds = array<i64: 128, 384>}, {transform_indices = @transform_2, window_bounds = array<i64: 32, 384>}]} {
    %c0 = arith.constant 0 : index
    %c0_0 = arith.constant 0 : index
    %0 = vector.load %arg1[%c0, %c0_0] : memref<32x128xf32, #tpu.memory_space<vmem>>, vector<32x128xf32>
    %c0_1 = arith.constant 0 : index
    %c0_2 = arith.constant 0 : index
    %1 = vector.load %arg2[%c0_1, %c0_2] : memref<128x384xf32, #tpu.memory_space<vmem>>, vector<128x384xf32>
    %cst = arith.constant dense<0.000000e+00> : vector<32x384xf32>
    %2 = tpu.matmul %0, %1, %cst {dimension_numbers = #tpu.dot_dimension_numbers<[1], [0], [0], [1], [0, 0, 1, 1], [], []>} : vector<32x128xf32>, vector<128x384xf32>, vector<32x384xf32> -> vector<32x384xf32>
    %c0_3 = arith.constant 0 : index
    %c0_4 = arith.constant 0 : index
    %3 = vector.load %arg3[%c0_3, %c0_4] : memref<32x384xf32, #tpu.memory_space<vmem>>, vector<32x384xf32>
    tpu.vector_store %arg3[%c0_3, %c0_4], %2 {strides = array<i32>} : memref<32x384xf32, #tpu.memory_space<vmem>>, vector<32x384xf32>,
    return
  }
  func.func @transform_0(%arg0: i32) -> (i32, i32) {
    %c0_i32 = arith.constant 0 : i32
    %c0_i32_0 = arith.constant 0 : i32
    return %arg0, %c0_i32 : i32, i32
  }
  func.func @transform_1(%arg0: i32) -> (i32, i32) {
    %c0_i32 = arith.constant 0 : i32
    %c0_i32_0 = arith.constant 0 : i32
    %c0_i32_1 = arith.constant 0 : i32
    return %c0_i32, %c0_i32_0 : i32, i32
  }
  func.func @transform_2(%arg0: i32) -> (i32, i32) {
    %c0_i32 = arith.constant 0 : i32
    %c0_i32_0 = arith.constant 0 : i32
    return %arg0, %c0_i32 : i32, i32
  }
}

</mosaic_0001>

<bundles_post_ra>
// kernel: linear_pallas.1
= control target key start
LH: loop header
LB: loop body
LE: loop exit
PB: predicated region body
PF: predicated region fallthrough
CT: control target
= control target key end

     0   :  { %7 = vsyncpa [#allocation3], 0  ;;  %s567_s0 = inlined_call_operand.hbm [shape: f32[32,128], index: 0, kind: input, shape index: {}]   ;;  %s568_s1 = inlined_call_operand.hbm [shape: f32[128,384], index: 1, kind: input, shape index: {}]   ;;  %s569_s2 = inlined_call_operand.hbm [shape: f32[32,384], index: 2, kind: output, shape index: {}]  }
   0x1   :  { %8 = vsyncpa [#allocation6], 0 }
   0x2   :  { %9 = vsyncpa [#allocation4], 0  ;;  %s498_s9 = smov [#allocation2]   ;;  %s426_s13 = scalar_lea.hbm %s567_s0, 512 }
   0x3   :  { %s15_s10 = sshll.u32 %s498_s9, 4  ;;  %p427_p0 = scmp.ne.s32.totalorder %s567_s0, %s426_s13  ;;  %s16_s10 = int_to_ptr.vmem [resolvable:$true] %s15_s10 }
   0x4   :  { %p430_p1 = scmp.lt.u32.totalorder %s426_s13, %s567_s0 }
   0x6   :  { %p432_p2 = pnand %p430_p1, %p427_p0 }
   0x8   :  { %435 = shalt.err (!%p432_p2)
}
   0x9   :  { %s436_s18 = scalar_lea.vmem %s16_s10, 512  ;;  %p441_p4 = scmp.lt.s32.totalorder %s16_s10, %s16_s10 }
   0xa   :  { %p437_p3 = scmp.ne.s32.totalorder %s16_s10, %s436_s18  ;;  %p442_p5 = scmp.lt.s32.totalorder %s436_s18, %s436_s18 }
   0xc   :  { %p443_p6 = por %p442_p5, %p441_p4 }
   0xe   :  { %p444_p7 = pnand %p443_p6, %p437_p3 }
  0x10   :  { %447 = shalt.err (!%p444_p7)
}
  0x11   :  { %s499_s19 = smov 128   ;;  %s500_s20 = smov 8  }
  0x12   :  { %21 = dma.hbm_to_vmem [thread:$0]  %s567_s0, 512, %s16_s10, [#allocation3], %s499_s19, %s499_s19, %s500_s20  }
  0x13   :  { %s501_s23 = smov [#allocation5]   ;;  %s448_s27 = scalar_lea.hbm %s568_s1, 6144 }
  0x14   :  { %s27_s24 = sshll.u32 %s501_s23, 4  ;;  %p449_p8 = scmp.ne.s32.totalorder %s568_s1, %s448_s27  ;;  %s28_s24 = int_to_ptr.vmem [resolvable:$true] %s27_s24 }
  0x15   :  { %p452_p9 = scmp.lt.u32.totalorder %s448_s27, %s568_s1 }
  0x17   :  { %p454_p10 = pnand %p452_p9, %p449_p8 }
  0x19   :  { %457 = shalt.err (!%p454_p10)
}
  0x1a   :  { %s458_s4 = scalar_lea.vmem %s28_s24, 6144  ;;  %p463_p12 = scmp.lt.s32.totalorder %s28_s24, %s28_s24 }
  0x1b   :  { %p459_p11 = scmp.ne.s32.totalorder %s28_s24, %s458_s4  ;;  %p464_p13 = scmp.lt.s32.totalorder %s458_s4, %s458_s4 }
  0x1d   :  { %p465_p0 = por %p464_p13, %p463_p12 }
  0x1f   :  { %p466_p1 = pnand %p465_p0, %p459_p11 }
  0x21   :  { %469 = shalt.err (!%p466_p1)
}
  0x22   :  { %s502_s0 = smov 384   ;;  %s503_s5 = smov 24  }
  0x23   :  { %33 = dma.hbm_to_vmem [thread:$0]  %s568_s1, 6144, %s28_s24, [#allocation6], %s502_s0, %s502_s0, %s503_s5  }
  0x24   :  { %492 = dma.done.wait [#allocation3], 512  }
  0x25   :  { %493 = vsyncadd [#allocation3], 4294966784 }
  0x26   :  { %494 = dma.done.wait [#allocation6], 6144  }
  0x27   :  { %495 = vsyncadd [#allocation6], 4294961152  ;;  %v504_v0 = vmov 0.0   ;;  %v45_v1 = vld [vmem:[#allocation5 + $0x8] sm:$0xff]  ;;  %v48_v2 = vld [vmem:[#allocation5 + $0x20] sm:$0xff]  ;;  %s505_s1 = smov [#allocation7]  }
  0x28   :  { %156 = vmatprep.mubr.f32.mxu0 %v504_v0  ;;  %v44_v3 = vld [vmem:[#allocation5] sm:$0xff]  ;;  %v354_v4 = vpack.c.bf16 %v48_v2, %v45_v1  ;;  %v47_v5 = vld [vmem:[#allocation5 + $0x18] sm:$0xff]  ;;  %v54_v7 = vld [vmem:[#allocation5 + $0x50] sm:$0xff]  ;;  %s283_s8 = sshll.u32 %s505_s1, 4  ;;  %s284_s8 = int_to_ptr.vmem [resolvable:$true] %s283_s8 }
  0x29   :  { %v51_v6 = vld [vmem:[#allocation5 + $0x38] sm:$0xff]  ;;  %v356_v8 = vpack.c.bf16 %v47_v5, %v44_v3  ;;  %v50_v10 = vld [vmem:[#allocation5 + $0x30] sm:$0xff]  ;;  %v53_v11 = vld [vmem:[#allocation5 + $0x48] sm:$0xff]  ;;  %s470_s9 = scalar_lea.vmem %s284_s8, 1536  ;;  %p475_p3 = scmp.lt.s32.totalorder %s284_s8, %s284_s8 }
  0x2a   :  { %v358_v9 = vpack.c.bf16 %v54_v7, %v51_v6  ;;  %v46_v12 = vld [vmem:[#allocation5 + $0x10] sm:$0xff]  ;;  %355 = vmatprep.subr.bf16.mxu0 %v354_v4  ;;  %v49_v13 = vld [vmem:[#allocation5 + $0x28] sm:$0xff]  ;;  %v60_v15 = vld [vmem:[#allocation5 + $0x80] sm:$0xff]  ;;  %v360_v16 = vpack.c.bf16 %v53_v11, %v50_v10  ;;  %p471_p2 = scmp.ne.s32.totalorder %s284_s8, %s470_s9  ;;  %p476_p4 = scmp.lt.s32.totalorder %s470_s9, %s470_s9 }
  0x2b   :  { %v57_v14 = vld [vmem:[#allocation5 + $0x68] sm:$0xff]  ;;  %357 = vmatpush1.bf16.msra.mxu0 %v356_v8  ;;  %v386_v17 = vpack.c.bf16 %v49_v13, %v46_v12  ;;  %v52_v18 = vld [vmem:[#allocation5 + $0x40] sm:$0xff]  ;;  %v59_v21 = vld [vmem:[#allocation5 + $0x78] sm:$0xff] }
  0x2c   :  { %359 = vmatprep.subr.bf16.mxu0 %v358_v9  ;;  %v362_v19 = vpack.c.bf16 %v60_v15, %v57_v14  ;;  %v56_v20 = vld [vmem:[#allocation5 + $0x60] sm:$0xff]  ;;  %v55_v22 = vld [vmem:[#allocation5 + $0x58] sm:$0xff]  ;;  %v66_v25 = vld [vmem:[#allocation5 + $0xb0] sm:$0xff]  ;;  %p477_p5 = por %p476_p4, %p475_p3 }
  0x2d   :  { %387 = vmatprep.subr.bf16.mxu1 %v386_v17  ;;  %v390_v23 = vpack.c.bf16 %v55_v22, %v52_v18  ;;  %v63_v24 = vld [vmem:[#allocation5 + $0x98] sm:$0xff]  ;;  %v58_v26 = vld [vmem:[#allocation5 + $0x70] sm:$0xff]  ;;  %v61_v27 = vld [vmem:[#allocation5 + $0x88] sm:$0xff]  ;;  %v364_v28 = vpack.c.bf16 %v59_v21, %v56_v20 }
  0x2e   :  { %389 = vmatpush3.bf16.msra.mxu1 %v386_v17  ;;  %v62_v29 = vld [vmem:[#allocation5 + $0x90] sm:$0xff]  ;;  %v394_v30 = vpack.c.bf16 %v61_v27, %v58_v26  ;;  %v366_v31 = vpack.c.bf16 %v66_v25, %v63_v24  ;;  %v65_v32 = vld [vmem:[#allocation5 + $0xa8] sm:$0xff]  ;;  %v64_v33 = vld [vmem:[#allocation5 + $0xa0] sm:$0xff]  ;;  %p478_p6 = pnand %p477_p5, %p471_p2 }
  0x2f   :  { %361 = vmatpush1.bf16.msra.mxu0 %v360_v16  ;;  %391 = vmatprep.subr.bf16.mxu1 %v390_v23  ;;  %v67_v34 = vld [vmem:[#allocation5 + $0xb8] sm:$0xff]  ;;  %v69_v35 = vld [vmem:[#allocation5 + $0xc8] sm:$0xff]  ;;  %v72_v36 = vld [vmem:[#allocation5 + $0xe0] sm:$0xff]  ;;  %v368_v37 = vpack.c.bf16 %v65_v32, %v62_v29 }
  0x30   :  { %363 = vmatprep.subr.bf16.mxu0 %v362_v19  ;;  %v68_v38 = vld [vmem:[#allocation5 + $0xc0] sm:$0xff]  ;;  %v398_v39 = vpack.c.bf16 %v67_v34, %v64_v33  ;;  %v370_v40 = vpack.c.bf16 %v72_v36, %v69_v35  ;;  %v71_v41 = vld [vmem:[#allocation5 + $0xd8] sm:$0xff]  ;;  %v70_v42 = vld [vmem:[#allocation5 + $0xd0] sm:$0xff] }
  0x31   :  { %v73_v43 = vld [vmem:[#allocation5 + $0xe8] sm:$0xff]  ;;  %v75_v44 = vld [vmem:[#allocation5 + $0xf8] sm:$0xff]  ;;  %v78_v45 = vld [vmem:[#allocation5 + $0x110] sm:$0xff]  ;;  %v372_v46 = vpack.c.bf16 %v71_v41, %v68_v38 }
  0x32   :  { %393 = vmatpush3.bf16.msra.mxu1 %v390_v23  ;;  %v74_v47 = vld [vmem:[#allocation5 + $0xf0] sm:$0xff]  ;;  %v402_v48 = vpack.c.bf16 %v73_v43, %v70_v42  ;;  %v40_v49 = vld [vmem:[#allocation2] sm:$0xff]  ;;  %v374_v50 = vpack.c.bf16 %v78_v45, %v75_v44  ;;  %v77_v51 = vld [vmem:[#allocation5 + $0x108] sm:$0xff] }
  0x33   :  { %365 = vmatpush1.bf16.msra.mxu0 %v364_v28  ;;  %395 = vmatprep.subr.bf16.mxu1 %v394_v30  ;;  %v76_v52 = vld [vmem:[#allocation5 + $0x100] sm:$0xff]  ;;  %v79_v53 = vld [vmem:[#allocation5 + $0x118] sm:$0xff]  ;;  %v81_v54 = vld [vmem:[#allocation5 + $0x128] sm:$0xff]  ;;  %v376_v56 = vpack.c.bf16 %v77_v51, %v74_v47 }
  0x34   :  { %367 = vmatprep.subr.bf16.mxu0 %v366_v31  ;;  %348 = vmatprep.mubr.f32.mxu1 %v40_v49  ;;  %v84_v55 = vld [vmem:[#allocation5 + $0x140] sm:$0xff]  ;;  %v406_v58 = vpack.c.bf16 %v79_v53, %v76_v52  ;;  %v83_v60 = vld [vmem:[#allocation5 + $0x138] sm:$0xff]  ;;  %v82_v61 = vld [vmem:[#allocation5 + $0x130] sm:$0xff] }
  0x35   :  { %v80_v57 = vld [vmem:[#allocation5 + $0x120] sm:$0xff]  ;;  %v378_v59 = vpack.c.bf16 %v84_v55, %v81_v54  ;;  %v85_v62 = vld [vmem:[#allocation5 + $0x148] sm:$0xff]  ;;  %v87_v63 = vld [vmem:[#allocation5 + $0x158] sm:$0xff] }
  0x36   :  { %397 = vmatpush3.bf16.msra.mxu1 %v394_v30  ;;  %v90_v1 = vld [vmem:[#allocation5 + $0x170] sm:$0xff]  ;;  %v380_v2 = vpack.c.bf16 %v83_v60, %v80_v57  ;;  %v410_v4 = vpack.c.bf16 %v85_v62, %v82_v61  ;;  %v89_v6 = vld [vmem:[#allocation5 + $0x168] sm:$0xff]  ;;  %v88_v7 = vld [vmem:[#allocation5 + $0x160] sm:$0xff] }
  0x37   :  { %369 = vmatpush1.bf16.msra.mxu0 %v368_v37  ;;  %399 = vmatprep.subr.bf16.mxu1 %v398_v39  ;;  %v86_v3 = vld [vmem:[#allocation5 + $0x150] sm:$0xff]  ;;  %v382_v5 = vpack.c.bf16 %v90_v1, %v87_v63  ;;  %v91_v8 = vld [vmem:[#allocation5 + $0x178] sm:$0xff]  ;;  %v41_v11 = vld [vmem:[#allocation2 + $0x8] sm:$0xff] }
  0x38   :  { %371 = vmatprep.subr.bf16.mxu0 %v370_v40  ;;  %v384_v9 = vpack.c.bf16 %v89_v6, %v86_v3  ;;  %v414_v10 = vpack.c.bf16 %v91_v8, %v88_v7  ;;  %v42_v12 = vld [vmem:[#allocation2 + $0x10] sm:$0xff]  ;;  %v43_v13 = vld [vmem:[#allocation2 + $0x18] sm:$0xff] }
  0x3a   :  { %401 = vmatpush3.bf16.msra.mxu1 %v398_v39 }
  0x3b   :  { %373 = vmatpush1.bf16.msra.mxu0 %v372_v46  ;;  %403 = vmatprep.subr.bf16.mxu1 %v402_v48 }
  0x3c   :  { %375 = vmatprep.subr.bf16.mxu0 %v374_v50 }
  0x3e   :  { %405 = vmatpush3.bf16.msra.mxu1 %v402_v48 }
  0x3f   :  { %377 = vmatpush1.bf16.msra.mxu0 %v376_v56  ;;  %407 = vmatprep.subr.bf16.mxu1 %v406_v58 }
  0x40   :  { %379 = vmatprep.subr.bf16.mxu0 %v378_v59 }
  0x42   :  { %409 = vmatpush3.bf16.msra.mxu1 %v406_v58 }
  0x43   :  { %381 = vmatpush1.bf16.msra.mxu0 %v380_v2  ;;  %411 = vmatprep.subr.bf16.mxu1 %v410_v4 }
  0x44   :  { %383 = vmatprep.subr.bf16.mxu0 %v382_v5 }
  0x46   :  { %413 = vmatpush3.bf16.msra.mxu1 %v410_v4 }
  0x47   :  { %385 = vmatpush1.bf16.msra.mxu0 %v384_v9  ;;  %415 = vmatprep.subr.bf16.mxu1 %v414_v10 }
  0x4a   :  { %157 = vmatmul.mubr.f32.vlgmr.msra.gmra.mrb[0].mxu0 %v40_v49  ;;  %417 = vmatpush3.bf16.msra.mxu1 %v414_v10 }
  0x4b   :  { %162 = vmatprep.mubr.f32.mxu0 %v504_v0 }
  0x4d   :  { %349 = vmatmul.mubr.f32.vlgmr.msra.gmra.mrb[0].mxu1 %v41_v11 }
  0x4e   :  { %163 = vmatmul.mubr.f32.gmra.mrb[2].mxu0 %v41_v11  ;;  %351 = vmatprep.mubr.f32.mxu1 %v42_v12 }
  0x4f   :  { %168 = vmatprep.mubr.f32.mxu0 %v504_v0 }
  0x51   :  { %352 = vmatmul.mubr.f32.gmra.mrb[2].mxu1 %v43_v13 }
  0x52   :  { %169 = vmatmul.mubr.f32.gmra.mrb[4].mxu0 %v42_v12 }
  0x53   :  { %174 = vmatprep.mubr.f32.mxu0 %v504_v0 }
  0x56   :  { %175 = vmatmul.mubr.f32.gmra.mrb[6].mxu0 %v43_v13 }
 0x11d   :  { %v158_v14 = vpop.f32.mrb[0].mxu0 }
 0x11e   :  { %266 = vst [vmem:[#allocation7] sm:$0xff] %v158_v14  ;;  %v160_v15 = vpop.f32.mrb[1].mxu0 }
 0x11f   :  { %267 = vst [vmem:[#allocation7 + $0x8] sm:$0xff] %v160_v15 }
 0x120   :  { %v350_v16 = vpop.f32.mrb[0].mxu1 }
 0x121   :  { %v164_v17 = vpop.f32.mrb[2].mxu0  ;;  %271 = vst [vmem:[#allocation7 + $0x28] sm:$0xff] %v350_v16  ;;  %v247_v18 = vpop.f32.mrb[1].mxu1 }
 0x122   :  { %269 = vst [vmem:[#allocation7 + $0x18] sm:$0xff] %v164_v17  ;;  %v166_v19 = vpop.f32.mrb[3].mxu0  ;;  %268 = vst [vmem:[#allocation7 + $0x10] sm:$0xff] %v247_v18 }
 0x123   :  { %270 = vst [vmem:[#allocation7 + $0x20] sm:$0xff] %v166_v19 }
 0x124   :  { %v353_v20 = vpop.f32.mrb[2].mxu1 }
 0x125   :  { %v170_v21 = vpop.f32.mrb[4].mxu0  ;;  %277 = vst [vmem:[#allocation7 + $0x58] sm:$0xff] %v353_v20  ;;  %v257_v22 = vpop.f32.mrb[3].mxu1 }
 0x126   :  { %272 = vst [vmem:[#allocation7 + $0x30] sm:$0xff] %v170_v21  ;;  %v172_v23 = vpop.f32.mrb[5].mxu0  ;;  %274 = vst [vmem:[#allocation7 + $0x40] sm:$0xff] %v257_v22 }
 0x127   :  { %273 = vst [vmem:[#allocation7 + $0x38] sm:$0xff] %v172_v23 }
 0x129   :  { %v176_v0 = vpop.f32.mrb[6].mxu0 }
 0x12a   :  { %275 = vst [vmem:[#allocation7 + $0x48] sm:$0xff] %v176_v0  ;;  %v178_v24 = vpop.f32.mrb[7].mxu0 }
 0x12b   :  { %276 = vst [vmem:[#allocation7 + $0x50] sm:$0xff] %v178_v24 }
 0x12c   :  { %481 = shalt.err (!%p478_p6)
}
 0x12d   :  { %s482_s12 = scalar_lea.hbm %s569_s2, 1536 }
 0x12e   :  { %p483_p7 = scmp.ne.s32.totalorder %s569_s2, %s482_s12  ;;  %p486_p8 = scmp.lt.u32.totalorder %s482_s12, %s569_s2 }
 0x130   :  { %p488_p9 = pnand %p486_p8, %p483_p7 }
 0x132   :  { %491 = shalt.err (!%p488_p9)
}
 0x133   :  { %289 = dma.vmem_to_hbm [thread:$0]  %s284_s8, 1536, %s569_s2, [#allocation4], %s502_s0, %s502_s0, %s503_s5  }
 0x134   :  { %496 = dma.done.wait [#allocation4], 1536  }
 0x135   :  { %497 = vsyncadd [#allocation4], 4294965760 }
 0x136   :  { %293 = vsyncpa [#allocation3], 1 }
 0x137   :  { %294 = vsyncpa [#allocation6], 1 }
 0x138   :  { %295 = vsyncpa [#allocation4], 1 }

</bundles_post_ra>
